<compile_context>
chip_gen: v6e
topology: v6e:2x2x1
jax: 0.10.0
libtpu: 0.0.40
codegen_flags: <defaults>
</compile_context>

<pallas_src>
import math
import functools

import jax
import jax.numpy as jnp
import numpy as np
from jax.experimental import pallas as pl
from jax.experimental.pallas import tpu as pltpu

# ---------------- problem sizes (small, consistent with the module) ----------
B = 2          # batch
Q = 8          # query sequence length
K = 8          # key/value sequence length
C_Q = 16       # c_q
C_K = 16       # c_k  (== c_v, both projections consume kv_x)
C_HIDDEN = 8   # per-head hidden dim
H = 4          # no_heads
HC = H * C_HIDDEN


def attention_kernel(qx_ref, kvx_ref, bias_ref,
                     wq_ref, wk_ref, wv_ref,
                     wg_ref, bg_ref, wo_ref, bo_ref,
                     out_ref):
    """Single invocation processes the whole (tiny) problem.

    qx_ref  : [B*Q, C_Q]        kvx_ref : [B*K, C_K]
    bias_ref: [B, 1, Q, K]      (broadcast over heads inside the kernel)
    wq/wg   : [C_Q, H*C_HIDDEN] wk/wv   : [C_K, H*C_HIDDEN]
    bg      : [1, H*C_HIDDEN]   wo      : [H*C_HIDDEN, C_Q]   bo : [1, C_Q]
    out_ref : [B*Q, C_Q]
    """
    qx = qx_ref[...]            # [B*Q, C_Q]
    kvx = kvx_ref[...]          # [B*K, C_K]
    bias = bias_ref[...]        # [B, 1, Q, K]

    scale = 1.0 / math.sqrt(C_HIDDEN)

    # Projections for both batch elements at once (MXU).
    q = jnp.dot(qx, wq_ref[...], preferred_element_type=jnp.float32) * scale  # [B*Q, HC]
    k = jnp.dot(kvx, wk_ref[...], preferred_element_type=jnp.float32)         # [B*K, HC]
    v = jnp.dot(kvx, wv_ref[...], preferred_element_type=jnp.float32)         # [B*K, HC]

    # Gate: sigmoid(linear_g(q_x)), both batch elements at once.
    g = jax.nn.sigmoid(
        jnp.dot(qx, wg_ref[...], preferred_element_type=jnp.float32) + bg_ref[...]
    )                                                                          # [B*Q, HC]

    # ---- scores for every (batch, head), stacked into one [B*H*Q, K] slab ----
    score_tiles = []
    for b in range(B):
        qb = q[b * Q:(b + 1) * Q, :]          # [Q, HC]
        kbt = k[b * K:(b + 1) * K, :].T       # [HC, K]  (one transpose per batch)
        bias_b = bias[b, 0]                   # [Q, K]   (broadcasts over heads)
        for h in range(H):
            lo = h * C_HIDDEN
            hi = lo + C_HIDDEN
            s = jnp.dot(qb[:, lo:hi], kbt[lo:hi, :],
                        preferred_element_type=jnp.float32)                   # [Q, K]
            score_tiles.append(s + bias_b)
    s_all = jnp.concatenate(score_tiles, axis=0)                              # [B*H*Q, K]

    # ---- one softmax pass over all heads/batches (EUP exp + reciprocal) ----
    m = jnp.max(s_all, axis=-1, keepdims=True)
    e = jnp.exp(s_all - m)
    denom = jnp.sum(e, axis=-1, keepdims=True)
    a_all = e * pl.reciprocal(denom, approx=True)                             # [B*H*Q, K]

    # ---- weighted sum over values, regrouped into one [B*Q, HC] slab ----
    out_rows = []
    for b in range(B):
        vb = v[b * K:(b + 1) * K, :]          # [K, HC]
        heads = []
        for h in range(H):
            lo = h * C_HIDDEN
            hi = lo + C_HIDDEN
            row0 = (b * H + h) * Q
            ah = a_all[row0:row0 + Q, :]                                      # [Q, K]
            heads.append(jnp.dot(ah, vb[:, lo:hi],
                                 preferred_element_type=jnp.float32))         # [Q, Ch]
        out_rows.append(jnp.concatenate(heads, axis=-1))                      # [Q, HC]
    o = jnp.concatenate(out_rows, axis=0)                                     # [B*Q, HC]

    # ---- single gating multiply + single output projection ----
    o = o * g
    out_ref[...] = (
        jnp.dot(o, wo_ref[...], preferred_element_type=jnp.float32) + bo_ref[...]
    )


@functools.partial(jax.jit, static_argnames=())
def attention_forward(q_x, kv_x, bias, wq, wk, wv, wg, bg, wo, bo):
    """bias has shape [B, 1, Q, K] (broadcast over heads inside the kernel)."""
    qx_flat = q_x.reshape(B * Q, C_Q)
    kvx_flat = kv_x.reshape(B * K, C_K)

    out_flat = pl.pallas_call(
        attention_kernel,
        out_shape=jax.ShapeDtypeStruct((B * Q, C_Q), jnp.float32),
        grid=(1,),
        in_specs=[
            pl.BlockSpec((B * Q, C_Q), lambda i: (0, 0)),
            pl.BlockSpec((B * K, C_K), lambda i: (0, 0)),
            pl.BlockSpec((B, 1, Q, K), lambda i: (0, 0, 0, 0)),
            pl.BlockSpec((C_Q, HC), lambda i: (0, 0)),
            pl.BlockSpec((C_K, HC), lambda i: (0, 0)),
            pl.BlockSpec((C_K, HC), lambda i: (0, 0)),
            pl.BlockSpec((C_Q, HC), lambda i: (0, 0)),
            pl.BlockSpec((1, HC), lambda i: (0, 0)),
            pl.BlockSpec((HC, C_Q), lambda i: (0, 0)),
            pl.BlockSpec((1, C_Q), lambda i: (0, 0)),
        ],
        out_specs=pl.BlockSpec((B * Q, C_Q), lambda i: (0, 0)),
        compiler_params=pltpu.CompilerParams(
            dimension_semantics=("arbitrary",)),
    )(qx_flat, kvx_flat, bias, wq, wk, wv, wg, bg, wo, bo)

    return out_flat.reshape(B, Q, C_Q)


def reference_forward(q_x, kv_x, bias, wq, wk, wv, wg, bg, wo, bo):
    """Pure-jnp reference mirroring the PyTorch module semantics."""
    scale = 1.0 / math.sqrt(C_HIDDEN)
    q = (q_x @ wq).reshape(B, Q, H, C_HIDDEN).transpose(0, 2, 1, 3) * scale  # [B,H,Q,Ch]
    k = (kv_x @ wk).reshape(B, K, H, C_HIDDEN).transpose(0, 2, 1, 3)         # [B,H,K,Ch]
    v = (kv_x @ wv).reshape(B, K, H, C_HIDDEN).transpose(0, 2, 1, 3)         # [B,H,K,Ch]
    s = jnp.einsum("bhqc,bhkc->bhqk", q, k) + bias                           # [B,H,Q,K]
    a = jax.nn.softmax(s, axis=-1)
    o = jnp.einsum("bhqk,bhkc->bhqc", a, v)                                  # [B,H,Q,Ch]
    o = o.transpose(0, 2, 1, 3)                                              # [B,Q,H,Ch]
    g = jax.nn.sigmoid(q_x @ wg + bg).reshape(B, Q, H, C_HIDDEN)
    o = (o * g).reshape(B, Q, HC)
    return o @ wo + bo


if __name__ == "__main__":
    key = jax.random.PRNGKey(0)
    keys = jax.random.split(key, 9)

    q_x = jax.random.normal(keys[0], (B, Q, C_Q), dtype=jnp.float32)
    kv_x = jax.random.normal(keys[1], (B, K, C_K), dtype=jnp.float32)
    # One additive bias that broadcasts to [B, H, Q, K] (as in the module's API).
    bias_b1qk = 0.1 * jax.random.normal(keys[2], (B, 1, Q, K), dtype=jnp.float32)

    # Deterministic synthetic parameters ([in, out] layout).
    wq = 0.1 * jax.random.normal(keys[3], (C_Q, HC), dtype=jnp.float32)
    wk = 0.1 * jax.random.normal(keys[4], (C_K, HC), dtype=jnp.float32)
    wv = 0.1 * jax.random.normal(keys[5], (C_K, HC), dtype=jnp.float32)
    wg = 0.1 * jax.random.normal(keys[6], (C_Q, HC), dtype=jnp.float32)
    bg = jnp.zeros((1, HC), dtype=jnp.float32)   # Linear.__init__ fills bias with 0
    wo = 0.1 * jax.random.normal(keys[7], (HC, C_Q), dtype=jnp.float32)
    bo = jnp.zeros((1, C_Q), dtype=jnp.float32)  # Linear.__init__ fills bias with 0

    out = attention_forward(q_x, kv_x, bias_b1qk, wq, wk, wv, wg, bg, wo, bo)
    out = jax.block_until_ready(out)

    ref = reference_forward(q_x, kv_x, bias_b1qk, wq, wk, wv, wg, bg.reshape(HC),
                            wo, bo.reshape(C_Q))
    # approx reciprocal in the softmax normalization -> slightly relaxed tolerance.
    np.testing.assert_allclose(np.asarray(out), np.asarray(ref), rtol=2e-3, atol=2e-3)

    print("KERNEL_OK")
</pallas_src>

<mosaic_0001>
module attributes {stable_mosaic.version = 11 : i64} {
  func.func @attention_kernel(%arg0: i32, %arg1: memref<16x16xf32, #tpu.memory_space<vmem>>, %arg2: memref<16x16xf32, #tpu.memory_space<vmem>>, %arg3: memref<2x1x8x8xf32, #tpu.memory_space<vmem>>, %arg4: memref<16x32xf32, #tpu.memory_space<vmem>>, %arg5: memref<16x32xf32, #tpu.memory_space<vmem>>, %arg6: memref<16x32xf32, #tpu.memory_space<vmem>>, %arg7: memref<16x32xf32, #tpu.memory_space<vmem>>, %arg8: memref<1x32xf32, #tpu.memory_space<vmem>>, %arg9: memref<32x16xf32, #tpu.memory_space<vmem>>, %arg10: memref<1x16xf32, #tpu.memory_space<vmem>>, %arg11: memref<16x16xf32, #tpu.memory_space<vmem>>) attributes {dimension_semantics = [#tpu.dimension_semantics<arbitrary>], iteration_bounds = array<i64: 1>, scalar_prefetch = 0 : i64, scratch_operands = 0 : i64, tpu.core_type = #tpu.core_type<tc>, window_params = [{pipeline_mode = #tpu.pipeline_mode<synchronous>, transform_indices = @transform_0, window_bounds = array<i64: 16, 16>}, {pipeline_mode = #tpu.pipeline_mode<synchronous>, transform_indices = @transform_1, window_bounds = array<i64: 16, 16>}, {pipeline_mode = #tpu.pipeline_mode<synchronous>, transform_indices = @transform_2, window_bounds = array<i64: 2, 1, 8, 8>}, {pipeline_mode = #tpu.pipeline_mode<synchronous>, transform_indices = @transform_3, window_bounds = array<i64: 16, 32>}, {pipeline_mode = #tpu.pipeline_mode<synchronous>, transform_indices = @transform_4, window_bounds = array<i64: 16, 32>}, {pipeline_mode = #tpu.pipeline_mode<synchronous>, transform_indices = @transform_5, window_bounds = array<i64: 16, 32>}, {pipeline_mode = #tpu.pipeline_mode<synchronous>, transform_indices = @transform_6, window_bounds = array<i64: 16, 32>}, {pipeline_mode = #tpu.pipeline_mode<synchronous>, transform_indices = @transform_7, window_bounds = array<i64: 1, 32>}, {pipeline_mode = #tpu.pipeline_mode<synchronous>, transform_indices = @transform_8, window_bounds = array<i64: 32, 16>}, {pipeline_mode = #tpu.pipeline_mode<synchronous>, transform_indices = @transform_9, window_bounds = array<i64: 1, 16>}, {pipeline_mode = #tpu.pipeline_mode<synchronous>, transform_indices = @transform_10, window_bounds = array<i64: 16, 16>}]} {
    %c0 = arith.constant 0 : index
    %c0_0 = arith.constant 0 : index
    %0 = vector.load %arg1[%c0, %c0_0] : memref<16x16xf32, #tpu.memory_space<vmem>>, vector<16x16xf32>
    %c0_1 = arith.constant 0 : index
    %c0_2 = arith.constant 0 : index
    %1 = vector.load %arg2[%c0_1, %c0_2] : memref<16x16xf32, #tpu.memory_space<vmem>>, vector<16x16xf32>
    %c0_3 = arith.constant 0 : index
    %c0_4 = arith.constant 0 : index
    %c0_5 = arith.constant 0 : index
    %c0_6 = arith.constant 0 : index
    %2 = vector.load %arg3[%c0_3, %c0_4, %c0_5, %c0_6] : memref<2x1x8x8xf32, #tpu.memory_space<vmem>>, vector<2x1x8x8xf32>
    %c0_7 = arith.constant 0 : index
    %c0_8 = arith.constant 0 : index
    %3 = vector.load %arg4[%c0_7, %c0_8] : memref<16x32xf32, #tpu.memory_space<vmem>>, vector<16x32xf32>
    %cst = arith.constant dense<0.000000e+00> : vector<16x32xf32>
    %4 = tpu.matmul %0, %3, %cst {dimension_numbers = #tpu.dot_dimension_numbers<[1], [0], [0], [1], [0, 0, 1, 1], [], []>} : vector<16x16xf32>, vector<16x32xf32>, vector<16x32xf32> -> vector<16x32xf32>
    %cst_9 = arith.constant 0.353553385 : f32
    %5 = vector.broadcast %cst_9 : f32 to vector<16x32xf32>
    %6 = arith.mulf %4, %5 : vector<16x32xf32>
    %c0_10 = arith.constant 0 : index
    %c0_11 = arith.constant 0 : index
    %7 = vector.load %arg5[%c0_10, %c0_11] : memref<16x32xf32, #tpu.memory_space<vmem>>, vector<16x32xf32>
    %cst_12 = arith.constant dense<0.000000e+00> : vector<16x32xf32>
    %8 = tpu.matmul %1, %7, %cst_12 {dimension_numbers = #tpu.dot_dimension_numbers<[1], [0], [0], [1], [0, 0, 1, 1], [], []>} : vector<16x16xf32>, vector<16x32xf32>, vector<16x32xf32> -> vector<16x32xf32>
    %c0_13 = arith.constant 0 : index
    %c0_14 = arith.constant 0 : index
    %9 = vector.load %arg6[%c0_13, %c0_14] : memref<16x32xf32, #tpu.memory_space<vmem>>, vector<16x32xf32>
    %cst_15 = arith.constant dense<0.000000e+00> : vector<16x32xf32>
    %10 = tpu.matmul %1, %9, %cst_15 {dimension_numbers = #tpu.dot_dimension_numbers<[1], [0], [0], [1], [0, 0, 1, 1], [], []>} : vector<16x16xf32>, vector<16x32xf32>, vector<16x32xf32> -> vector<16x32xf32>
    %c0_16 = arith.constant 0 : index
    %c0_17 = arith.constant 0 : index
    %11 = vector.load %arg7[%c0_16, %c0_17] : memref<16x32xf32, #tpu.memory_space<vmem>>, vector<16x32xf32>
    %cst_18 = arith.constant dense<0.000000e+00> : vector<16x32xf32>
    %12 = tpu.matmul %0, %11, %cst_18 {dimension_numbers = #tpu.dot_dimension_numbers<[1], [0], [0], [1], [0, 0, 1, 1], [], []>} : vector<16x16xf32>, vector<16x32xf32>, vector<16x32xf32> -> vector<16x32xf32>
    %c0_19 = arith.constant 0 : index
    %c0_20 = arith.constant 0 : index
    %13 = vector.load %arg8[%c0_19, %c0_20] : memref<1x32xf32, #tpu.memory_space<vmem>>, vector<1x32xf32>
    %14 = vector.broadcast %13 : vector<1x32xf32> to vector<16x32xf32>
    %15 = arith.addf %12, %14 : vector<16x32xf32>
    %16 = arith.negf %15 : vector<16x32xf32>
    %17 = math.exp %16 : vector<16x32xf32>
    %cst_21 = arith.constant 1.000000e+00 : f32
    %18 = vector.broadcast %cst_21 : f32 to vector<16x32xf32>
    %19 = arith.addf %18, %17 : vector<16x32xf32>
    %20 = arith.divf %18, %19 : vector<16x32xf32>
    %21 = vector.extract_strided_slice %6 {offsets = [0, 0], sizes = [8, 32], strides = [1, 1]} : vector<16x32xf32> to vector<8x32xf32>
    %22 = vector.extract_strided_slice %8 {offsets = [0, 0], sizes = [8, 32], strides = [1, 1]} : vector<16x32xf32> to vector<8x32xf32>
    %23 = tpu.transpose %22, [1, 0] : vector<8x32xf32> -> vector<32x8xf32>
    %24 = vector.extract_strided_slice %2 {offsets = [0, 0, 0, 0], sizes = [1, 1, 8, 8], strides = [1, 1, 1, 1]} : vector<2x1x8x8xf32> to vector<1x1x8x8xf32>
    %25 = vector.shape_cast %24 : vector<1x1x8x8xf32> to vector<8x8xf32>
    %26 = vector.extract_strided_slice %21 {offsets = [0, 0], sizes = [8, 8], strides = [1, 1]} : vector<8x32xf32> to vector<8x8xf32>
    %27 = vector.extract_strided_slice %23 {offsets = [0, 0], sizes = [8, 8], strides = [1, 1]} : vector<32x8xf32> to vector<8x8xf32>
    %cst_22 = arith.constant dense<0.000000e+00> : vector<8x8xf32>
    %28 = tpu.matmul %26, %27, %cst_22 {dimension_numbers = #tpu.dot_dimension_numbers<[1], [0], [0], [1], [0, 0, 1, 1], [], []>} : vector<8x8xf32>, vector<8x8xf32>, vector<8x8xf32> -> vector<8x8xf32>
    %29 = arith.addf %28, %25 : vector<8x8xf32>
    %30 = vector.extract_strided_slice %21 {offsets = [0, 8], sizes = [8, 8], strides = [1, 1]} : vector<8x32xf32> to vector<8x8xf32>
    %31 = vector.extract_strided_slice %23 {offsets = [8, 0], sizes = [8, 8], strides = [1, 1]} : vector<32x8xf32> to vector<8x8xf32>
    %cst_23 = arith.constant dense<0.000000e+00> : vector<8x8xf32>
    %32 = tpu.matmul %30, %31, %cst_23 {dimension_numbers = #tpu.dot_dimension_numbers<[1], [0], [0], [1], [0, 0, 1, 1], [], []>} : vector<8x8xf32>, vector<8x8xf32>, vector<8x8xf32> -> vector<8x8xf32>
    %33 = arith.addf %32, %25 : vector<8x8xf32>
    %34 = vector.extract_strided_slice %21 {offsets = [0, 16], sizes = [8, 8], strides = [1, 1]} : vector<8x32xf32> to vector<8x8xf32>
    %35 = vector.extract_strided_slice %23 {offsets = [16, 0], sizes = [8, 8], strides = [1, 1]} : vector<32x8xf32> to vector<8x8xf32>
    %cst_24 = arith.constant dense<0.000000e+00> : vector<8x8xf32>
    %36 = tpu.matmul %34, %35, %cst_24 {dimension_numbers = #tpu.dot_dimension_numbers<[1], [0], [0], [1], [0, 0, 1, 1], [], []>} : vector<8x8xf32>, vector<8x8xf32>, vector<8x8xf32> -> vector<8x8xf32>
    %37 = arith.addf %36, %25 : vector<8x8xf32>
    %38 = vector.extract_strided_slice %21 {offsets = [0, 24], sizes = [8, 8], strides = [1, 1]} : vector<8x32xf32> to vector<8x8xf32>
    %39 = vector.extract_strided_slice %23 {offsets = [24, 0], sizes = [8, 8], strides = [1, 1]} : vector<32x8xf32> to vector<8x8xf32>
    %cst_25 = arith.constant dense<0.000000e+00> : vector<8x8xf32>
    %40 = tpu.matmul %38, %39, %cst_25 {dimension_numbers = #tpu.dot_dimension_numbers<[1], [0], [0], [1], [0, 0, 1, 1], [], []>} : vector<8x8xf32>, vector<8x8xf32>, vector<8x8xf32> -> vector<8x8xf32>
    %41 = arith.addf %40, %25 : vector<8x8xf32>
    %42 = vector.extract_strided_slice %6 {offsets = [8, 0], sizes = [8, 32], strides = [1, 1]} : vector<16x32xf32> to vector<8x32xf32>
    %43 = vector.extract_strided_slice %8 {offsets = [8, 0], sizes = [8, 32], strides = [1, 1]} : vector<16x32xf32> to vector<8x32xf32>
    %44 = tpu.transpose %43, [1, 0] : vector<8x32xf32> -> vector<32x8xf32>
    %45 = vector.extract_strided_slice %2 {offsets = [1, 0, 0, 0], sizes = [1, 1, 8, 8], strides = [1, 1, 1, 1]} : vector<2x1x8x8xf32> to vector<1x1x8x8xf32>
    %46 = vector.shape_cast %45 : vector<1x1x8x8xf32> to vector<8x8xf32>
    %47 = vector.extract_strided_slice %42 {offsets = [0, 0], sizes = [8, 8], strides = [1, 1]} : vector<8x32xf32> to vector<8x8xf32>
    %48 = vector.extract_strided_slice %44 {offsets = [0, 0], sizes = [8, 8], strides = [1, 1]} : vector<32x8xf32> to vector<8x8xf32>
    %cst_26 = arith.constant dense<0.000000e+00> : vector<8x8xf32>
    %49 = tpu.matmul %47, %48, %cst_26 {dimension_numbers = #tpu.dot_dimension_numbers<[1], [0], [0], [1], [0, 0, 1, 1], [], []>} : vector<8x8xf32>, vector<8x8xf32>, vector<8x8xf32> -> vector<8x8xf32>
    %50 = arith.addf %49, %46 : vector<8x8xf32>
    %51 = vector.extract_strided_slice %42 {offsets = [0, 8], sizes = [8, 8], strides = [1, 1]} : vector<8x32xf32> to vector<8x8xf32>
    %52 = vector.extract_strided_slice %44 {offsets = [8, 0], sizes = [8, 8], strides = [1, 1]} : vector<32x8xf32> to vector<8x8xf32>
    %cst_27 = arith.constant dense<0.000000e+00> : vector<8x8xf32>
    %53 = tpu.matmul %51, %52, %cst_27 {dimension_numbers = #tpu.dot_dimension_numbers<[1], [0], [0], [1], [0, 0, 1, 1], [], []>} : vector<8x8xf32>, vector<8x8xf32>, vector<8x8xf32> -> vector<8x8xf32>
    %54 = arith.addf %53, %46 : vector<8x8xf32>
    %55 = vector.extract_strided_slice %42 {offsets = [0, 16], sizes = [8, 8], strides = [1, 1]} : vector<8x32xf32> to vector<8x8xf32>
    %56 = vector.extract_strided_slice %44 {offsets = [16, 0], sizes = [8, 8], strides = [1, 1]} : vector<32x8xf32> to vector<8x8xf32>
    %cst_28 = arith.constant dense<0.000000e+00> : vector<8x8xf32>
    %57 = tpu.matmul %55, %56, %cst_28 {dimension_numbers = #tpu.dot_dimension_numbers<[1], [0], [0], [1], [0, 0, 1, 1], [], []>} : vector<8x8xf32>, vector<8x8xf32>, vector<8x8xf32> -> vector<8x8xf32>
    %58 = arith.addf %57, %46 : vector<8x8xf32>
    %59 = vector.extract_strided_slice %42 {offsets = [0, 24], sizes = [8, 8], strides = [1, 1]} : vector<8x32xf32> to vector<8x8xf32>
    %60 = vector.extract_strided_slice %44 {offsets = [24, 0], sizes = [8, 8], strides = [1, 1]} : vector<32x8xf32> to vector<8x8xf32>
    %cst_29 = arith.constant dense<0.000000e+00> : vector<8x8xf32>
    %61 = tpu.matmul %59, %60, %cst_29 {dimension_numbers = #tpu.dot_dimension_numbers<[1], [0], [0], [1], [0, 0, 1, 1], [], []>} : vector<8x8xf32>, vector<8x8xf32>, vector<8x8xf32> -> vector<8x8xf32>
    %62 = arith.addf %61, %46 : vector<8x8xf32>
    %63 = tpu.concatenate %29, %33, %37, %41, %50, %54, %58, %62 in 0 : vector<8x8xf32>, vector<8x8xf32>, vector<8x8xf32>, vector<8x8xf32>, vector<8x8xf32>, vector<8x8xf32>, vector<8x8xf32>, vector<8x8xf32> -> vector<64x8xf32>
    %cst_30 = arith.constant dense<0xFF800000> : vector<64xf32>
    %64 = vector.multi_reduction <maximumf>, %63, %cst_30 [1] : vector<64x8xf32> to vector<64xf32>
    %65 = vector.shape_cast %64 : vector<64xf32> to vector<64x1xf32>
    %66 = vector.broadcast %65 : vector<64x1xf32> to vector<64x8xf32>
    %67 = arith.subf %63, %66 : vector<64x8xf32>
    %68 = math.exp %67 : vector<64x8xf32>
    %cst_31 = arith.constant dense<0.000000e+00> : vector<64xf32>
    %69 = vector.multi_reduction <add>, %68, %cst_31 [1] : vector<64x8xf32> to vector<64xf32>
    %70 = vector.shape_cast %69 : vector<64xf32> to vector<64x1xf32>
    %71 = tpu.reciprocal %70 {approx = true} : vector<64x1xf32> -> vector<64x1xf32>
    %72 = vector.broadcast %71 : vector<64x1xf32> to vector<64x8xf32>
    %73 = arith.mulf %68, %72 : vector<64x8xf32>
    %74 = vector.extract_strided_slice %10 {offsets = [0, 0], sizes = [8, 32], strides = [1, 1]} : vector<16x32xf32> to vector<8x32xf32>
    %75 = vector.extract_strided_slice %73 {offsets = [0, 0], sizes = [8, 8], strides = [1, 1]} : vector<64x8xf32> to vector<8x8xf32>
    %76 = vector.extract_strided_slice %74 {offsets = [0, 0], sizes = [8, 8], strides = [1, 1]} : vector<8x32xf32> to vector<8x8xf32>
    %cst_32 = arith.constant dense<0.000000e+00> : vector<8x8xf32>
    %77 = tpu.matmul %75, %76, %cst_32 {dimension_numbers = #tpu.dot_dimension_numbers<[1], [0], [0], [1], [0, 0, 1, 1], [], []>} : vector<8x8xf32>, vector<8x8xf32>, vector<8x8xf32> -> vector<8x8xf32>
    %78 = vector.extract_strided_slice %73 {offsets = [8, 0], sizes = [8, 8], strides = [1, 1]} : vector<64x8xf32> to vector<8x8xf32>
    %79 = vector.extract_strided_slice %74 {offsets = [0, 8], sizes = [8, 8], strides = [1, 1]} : vector<8x32xf32> to vector<8x8xf32>
    %cst_33 = arith.constant dense<0.000000e+00> : vector<8x8xf32>
    %80 = tpu.matmul %78, %79, %cst_33 {dimension_numbers = #tpu.dot_dimension_numbers<[1], [0], [0], [1], [0, 0, 1, 1], [], []>} : vector<8x8xf32>, vector<8x8xf32>, vector<8x8xf32> -> vector<8x8xf32>
    %81 = vector.extract_strided_slice %73 {offsets = [16, 0], sizes = [8, 8], strides = [1, 1]} : vector<64x8xf32> to vector<8x8xf32>
    %82 = vector.extract_strided_slice %74 {offsets = [0, 16], sizes = [8, 8], strides = [1, 1]} : vector<8x32xf32> to vector<8x8xf32>
    %cst_34 = arith.constant dense<0.000000e+00> : vector<8x8xf32>
    %83 = tpu.matmul %81, %82, %cst_34 {dimension_numbers = #tpu.dot_dimension_numbers<[1], [0], [0], [1], [0, 0, 1, 1], [], []>} : vector<8x8xf32>, vector<8x8xf32>, vector<8x8xf32> -> vector<8x8xf32>
    %84 = vector.extract_strided_slice %73 {offsets = [24, 0], sizes = [8, 8], strides = [1, 1]} : vector<64x8xf32> to vector<8x8xf32>
    %85 = vector.extract_strided_slice %74 {offsets = [0, 24], sizes = [8, 8], strides = [1, 1]} : vector<8x32xf32> to vector<8x8xf32>
    %cst_35 = arith.constant dense<0.000000e+00> : vector<8x8xf32>
    %86 = tpu.matmul %84, %85, %cst_35 {dimension_numbers = #tpu.dot_dimension_numbers<[1], [0], [0], [1], [0, 0, 1, 1], [], []>} : vector<8x8xf32>, vector<8x8xf32>, vector<8x8xf32> -> vector<8x8xf32>
    %87 = tpu.concatenate %77, %80, %83, %86 in 1 : vector<8x8xf32>, vector<8x8xf32>, vector<8x8xf32>, vector<8x8xf32> -> vector<8x32xf32>
    %88 = vector.extract_strided_slice %10 {offsets = [8, 0], sizes = [8, 32], strides = [1, 1]} : vector<16x32xf32> to vector<8x32xf32>
    %89 = vector.extract_strided_slice %73 {offsets = [32, 0], sizes = [8, 8], strides = [1, 1]} : vector<64x8xf32> to vector<8x8xf32>
    %90 = vector.extract_strided_slice %88 {offsets = [0, 0], sizes = [8, 8], strides = [1, 1]} : vector<8x32xf32> to vector<8x8xf32>
    %cst_36 = arith.constant dense<0.000000e+00> : vector<8x8xf32>
    %91 = tpu.matmul %89, %90, %cst_36 {dimension_numbers = #tpu.dot_dimension_numbers<[1], [0], [0], [1], [0, 0, 1, 1], [], []>} : vector<8x8xf32>, vector<8x8xf32>, vector<8x8xf32> -> vector<8x8xf32>
    %92 = vector.extract_strided_slice %73 {offsets = [40, 0], sizes = [8, 8], strides = [1, 1]} : vector<64x8xf32> to vector<8x8xf32>
    %93 = vector.extract_strided_slice %88 {offsets = [0, 8], sizes = [8, 8], strides = [1, 1]} : vector<8x32xf32> to vector<8x8xf32>
    %cst_37 = arith.constant dense<0.000000e+00> : vector<8x8xf32>
    %94 = tpu.matmul %92, %93, %cst_37 {dimension_numbers = #tpu.dot_dimension_numbers<[1], [0], [0], [1], [0, 0, 1, 1], [], []>} : vector<8x8xf32>, vector<8x8xf32>, vector<8x8xf32> -> vector<8x8xf32>
    %95 = vector.extract_strided_slice %73 {offsets = [48, 0], sizes = [8, 8], strides = [1, 1]} : vector<64x8xf32> to vector<8x8xf32>
    %96 = vector.extract_strided_slice %88 {offsets = [0, 16], sizes = [8, 8], strides = [1, 1]} : vector<8x32xf32> to vector<8x8xf32>
    %cst_38 = arith.constant dense<0.000000e+00> : vector<8x8xf32>
    %97 = tpu.matmul %95, %96, %cst_38 {dimension_numbers = #tpu.dot_dimension_numbers<[1], [0], [0], [1], [0, 0, 1, 1], [], []>} : vector<8x8xf32>, vector<8x8xf32>, vector<8x8xf32> -> vector<8x8xf32>
    %98 = vector.extract_strided_slice %73 {offsets = [56, 0], sizes = [8, 8], strides = [1, 1]} : vector<64x8xf32> to vector<8x8xf32>
    %99 = vector.extract_strided_slice %88 {offsets = [0, 24], sizes = [8, 8], strides = [1, 1]} : vector<8x32xf32> to vector<8x8xf32>
    %cst_39 = arith.constant dense<0.000000e+00> : vector<8x8xf32>
    %100 = tpu.matmul %98, %99, %cst_39 {dimension_numbers = #tpu.dot_dimension_numbers<[1], [0], [0], [1], [0, 0, 1, 1], [], []>} : vector<8x8xf32>, vector<8x8xf32>, vector<8x8xf32> -> vector<8x8xf32>
    %101 = tpu.concatenate %91, %94, %97, %100 in 1 : vector<8x8xf32>, vector<8x8xf32>, vector<8x8xf32>, vector<8x8xf32> -> vector<8x32xf32>
    %102 = tpu.concatenate %87, %101 in 0 : vector<8x32xf32>, vector<8x32xf32> -> vector<16x32xf32>
    %103 = arith.mulf %102, %20 : vector<16x32xf32>
    %c0_40 = arith.constant 0 : index
    %c0_41 = arith.constant 0 : index
    %104 = vector.load %arg9[%c0_40, %c0_41] : memref<32x16xf32, #tpu.memory_space<vmem>>, vector<32x16xf32>
    %cst_42 = arith.constant dense<0.000000e+00> : vector<16x16xf32>
    %105 = tpu.matmul %103, %104, %cst_42 {dimension_numbers = #tpu.dot_dimension_numbers<[1], [0], [0], [1], [0, 0, 1, 1], [], []>} : vector<16x32xf32>, vector<32x16xf32>, vector<16x16xf32> -> vector<16x16xf32>
    %c0_43 = arith.constant 0 : index
    %c0_44 = arith.constant 0 : index
    %106 = vector.load %arg10[%c0_43, %c0_44] : memref<1x16xf32, #tpu.memory_space<vmem>>, vector<1x16xf32>
    %107 = vector.broadcast %106 : vector<1x16xf32> to vector<16x16xf32>
    %108 = arith.addf %105, %107 : vector<16x16xf32>
    %c0_45 = arith.constant 0 : index
    %c0_46 = arith.constant 0 : index
    %109 = vector.load %arg11[%c0_45, %c0_46] : memref<16x16xf32, #tpu.memory_space<vmem>>, vector<16x16xf32>
    tpu.vector_store %arg11[%c0_45, %c0_46], %108 {strides = array<i32>} : memref<16x16xf32, #tpu.memory_space<vmem>>, vector<16x16xf32>,
    return
  }
  func.func @transform_0(%arg0: i32) -> (i32, i32) {
    %c0_i32 = arith.constant 0 : i32
    %c0_i32_0 = arith.constant 0 : i32
    %c0_i32_1 = arith.constant 0 : i32
    return %c0_i32, %c0_i32_0 : i32, i32
  }
  func.func @transform_1(%arg0: i32) -> (i32, i32) {
    %c0_i32 = arith.constant 0 : i32
    %c0_i32_0 = arith.constant 0 : i32
    %c0_i32_1 = arith.constant 0 : i32
    return %c0_i32, %c0_i32_0 : i32, i32
  }
  func.func @transform_2(%arg0: i32) -> (i32, i32, i32, i32) {
    %c0_i32 = arith.constant 0 : i32
    %c0_i32_0 = arith.constant 0 : i32
    %c0_i32_1 = arith.constant 0 : i32
    %c0_i32_2 = arith.constant 0 : i32
    %c0_i32_3 = arith.constant 0 : i32
    return %c0_i32, %c0_i32_0, %c0_i32_1, %c0_i32_2 : i32, i32, i32, i32
  }
  func.func @transform_3(%arg0: i32) -> (i32, i32) {
    %c0_i32 = arith.constant 0 : i32
    %c0_i32_0 = arith.constant 0 : i32
    %c0_i32_1 = arith.constant 0 : i32
    return %c0_i32, %c0_i32_0 : i32, i32
  }
  func.func @transform_4(%arg0: i32) -> (i32, i32) {
    %c0_i32 = arith.constant 0 : i32
    %c0_i32_0 = arith.constant 0 : i32
    %c0_i32_1 = arith.constant 0 : i32
    return %c0_i32, %c0_i32_0 : i32, i32
  }
  func.func @transform_5(%arg0: i32) -> (i32, i32) {
    %c0_i32 = arith.constant 0 : i32
    %c0_i32_0 = arith.constant 0 : i32
    %c0_i32_1 = arith.constant 0 : i32
    return %c0_i32, %c0_i32_0 : i32, i32
  }
  func.func @transform_6(%arg0: i32) -> (i32, i32) {
    %c0_i32 = arith.constant 0 : i32
    %c0_i32_0 = arith.constant 0 : i32
    %c0_i32_1 = arith.constant 0 : i32
    return %c0_i32, %c0_i32_0 : i32, i32
  }
  func.func @transform_7(%arg0: i32) -> (i32, i32) {
    %c0_i32 = arith.constant 0 : i32
    %c0_i32_0 = arith.constant 0 : i32
    %c0_i32_1 = arith.constant 0 : i32
    return %c0_i32, %c0_i32_0 : i32, i32
  }
  func.func @transform_8(%arg0: i32) -> (i32, i32) {
    %c0_i32 = arith.constant 0 : i32
    %c0_i32_0 = arith.constant 0 : i32
    %c0_i32_1 = arith.constant 0 : i32
    return %c0_i32, %c0_i32_0 : i32, i32
  }
  func.func @transform_9(%arg0: i32) -> (i32, i32) {
    %c0_i32 = arith.constant 0 : i32
    %c0_i32_0 = arith.constant 0 : i32
    %c0_i32_1 = arith.constant 0 : i32
    return %c0_i32, %c0_i32_0 : i32, i32
  }
  func.func @transform_10(%arg0: i32) -> (i32, i32) {
    %c0_i32 = arith.constant 0 : i32
    %c0_i32_0 = arith.constant 0 : i32
    %c0_i32_1 = arith.constant 0 : i32
    return %c0_i32, %c0_i32_0 : i32, i32
  }
}

</mosaic_0001>

<bundles_post_ra>
// kernel: attention_forward.1
= control target key start
LH: loop header
LB: loop body
LE: loop exit
PB: predicated region body
PF: predicated region fallthrough
CT: control target
= control target key end

     0   :  { %15 = vsyncpa [#allocation3], 0  ;;  %s2549_s0 = inlined_call_operand.vmem [shape: f32[16,16], index: 0, kind: input, shape index: {}]   ;;  %s2550_s1 = inlined_call_operand.vmem [shape: f32[16,16], index: 1, kind: input, shape index: {}]   ;;  %s2551_s2 = inlined_call_operand.vmem [shape: f32[2,1,8,8], index: 2, kind: input, shape index: {}]   ;;  %s2552_s3 = inlined_call_operand.hbm [shape: f32[16,32], index: 3, kind: input, shape index: {}]   ;;  %s2553_s4 = inlined_call_operand.hbm [shape: f32[16,32], index: 4, kind: input, shape index: {}]   ;;  %s2554_s5 = inlined_call_operand.hbm [shape: f32[16,32], index: 5, kind: input, shape index: {}]   ;;  %s2555_s6 = inlined_call_operand.hbm [shape: f32[16,32], index: 6, kind: input, shape index: {}]   ;;  %s2556_s7 = inlined_call_operand.vmem [shape: f32[1,32], index: 7, kind: input, shape index: {}]   ;;  %s2557_s8 = inlined_call_operand.vmem [shape: f32[32,16], index: 8, kind: input, shape index: {}]   ;;  %s2558_s9 = inlined_call_operand.vmem [shape: f32[1,16], index: 9, kind: input, shape index: {}]   ;;  %s2559_s10 = inlined_call_operand.hbm [shape: f32[16,16], index: 10, kind: output, shape index: {}]  }
   0x1   :  { %16 = vsyncpa [#allocation6], 0 }
   0x2   :  { %17 = vsyncpa [#allocation9], 0 }
   0x3   :  { %18 = vsyncpa [#allocation4], 0  ;;  %s2272_s13 = smov [#allocation5]   ;;  %s2273_s15 = smov [#allocation2]  }
   0x4   :  { %s42_s14 = sshll.u32 %s2272_s13, 4  ;;  %s30_s16 = sshll.u32 %s2273_s15, 4  ;;  %s43_s14 = int_to_ptr.vmem [resolvable:$true] %s42_s14  ;;  %s31_s16 = int_to_ptr.vmem [resolvable:$true] %s30_s16 }
   0x5   :  { %s2172_s17 = scalar_lea.vmem %s43_s14, 256  ;;  %p2177_p1 = scmp.lt.s32.totalorder %s43_s14, %s43_s14 }
   0x6   :  { %p2173_p0 = scmp.ne.s32.totalorder %s43_s14, %s2172_s17  ;;  %p2178_p2 = scmp.lt.s32.totalorder %s2172_s17, %s2172_s17 }
   0x8   :  { %p2179_p3 = por %p2178_p2, %p2177_p1 }
   0xa   :  { %p2180_p4 = pnand %p2179_p3, %p2173_p0 }
   0xc   :  { %2183 = shalt.err (!%p2180_p4)
}
   0xd   :  { %s2274_s18 = smov 128   ;;  %s2275_s19 = smov 8  }
   0xe   :  { %48 = dma.hbm_to_vmem [thread:$0]  %s2553_s4, 256, %s43_s14, [#allocation6], %s2274_s18, %s2274_s18, %s2275_s19  }
   0xf   :  { %s2192_s22 = scalar_lea.vmem %s31_s16, 256  ;;  %p2197_p6 = scmp.lt.s32.totalorder %s31_s16, %s31_s16 }
  0x10   :  { %p2193_p5 = scmp.ne.s32.totalorder %s31_s16, %s2192_s22  ;;  %p2198_p7 = scmp.lt.s32.totalorder %s2192_s22, %s2192_s22 }
  0x12   :  { %p2199_p8 = por %p2198_p7, %p2197_p6 }
  0x14   :  { %p2200_p9 = pnand %p2199_p8, %p2193_p5 }
  0x16   :  { %2203 = shalt.err (!%p2200_p9)
}
  0x17   :  { %36 = dma.hbm_to_vmem [thread:$0]  %s2552_s3, 256, %s31_s16, [#allocation3], %s2274_s18, %s2274_s18, %s2275_s19  }
  0x18   :  { %s2276_s25 = smov [#allocation7]   ;;  %s2277_s27 = smov [#allocation8]  }
  0x19   :  { %s54_s26 = sshll.u32 %s2276_s25, 4  ;;  %s66_s28 = sshll.u32 %s2277_s27, 4  ;;  %s55_s26 = int_to_ptr.vmem [resolvable:$true] %s54_s26  ;;  %s67_s28 = int_to_ptr.vmem [resolvable:$true] %s66_s28 }
  0x1a   :  { %s2212_s4 = scalar_lea.vmem %s55_s26, 256  ;;  %p2217_p11 = scmp.lt.s32.totalorder %s55_s26, %s55_s26 }
  0x1b   :  { %p2213_p10 = scmp.ne.s32.totalorder %s55_s26, %s2212_s4  ;;  %p2218_p12 = scmp.lt.s32.totalorder %s2212_s4, %s2212_s4 }
  0x1d   :  { %p2219_p13 = por %p2218_p12, %p2217_p11 }
  0x1f   :  { %p2220_p0 = pnand %p2219_p13, %p2213_p10 }
  0x21   :  { %2223 = shalt.err (!%p2220_p0)
}
  0x22   :  { %60 = dma.hbm_to_vmem [thread:$0]  %s2554_s5, 256, %s55_s26, [#allocation6], %s2274_s18, %s2274_s18, %s2275_s19  }
  0x23   :  { %s2232_s3 = scalar_lea.vmem %s67_s28, 256  ;;  %p2237_p2 = scmp.lt.s32.totalorder %s67_s28, %s67_s28 }
  0x24   :  { %p2233_p1 = scmp.ne.s32.totalorder %s67_s28, %s2232_s3  ;;  %p2238_p3 = scmp.lt.s32.totalorder %s2232_s3, %s2232_s3 }
  0x26   :  { %p2239_p4 = por %p2238_p3, %p2237_p2 }
  0x28   :  { %p2240_p5 = pnand %p2239_p4, %p2233_p1 }
  0x2a   :  { %2243 = shalt.err (!%p2240_p5)
}
  0x2b   :  { %72 = dma.hbm_to_vmem [thread:$0]  %s2555_s6, 256, %s67_s28, [#allocation9], %s2274_s18, %s2274_s18, %s2275_s19  }
  0x2c   :  { %2264 = dma.done.wait [#allocation3], 256  }
  0x2d   :  { %2265 = vsyncadd [#allocation3], 4294967040 }
  0x2e   :  { %2266 = dma.done.wait [#allocation6], 512  }
  0x2f   :  { %2267 = vsyncadd [#allocation6], 4294966784 }
  0x30   :  { %2268 = dma.done.wait [#allocation9], 256  }
  0x31   :  { %2269 = vsyncadd [#allocation9], 4294967040  ;;  %vm99_vm0 = vcmask 130048   ;;  %v98_v0 = vld [vmem:[#allocation2 + $0x8] sm:$0xff]  ;;  %v97_v1 = vld [vmem:[#allocation2] sm:$0xff]  ;;  %v2278_v10 = vmov 0.0  }
  0x32   :  { %v91_v2 = vld [vmem:[%s2549_s0] sm:$0xff]  ;;  %1991 = vmatprep.subr.mxu1 %v98_v0  ;;  %v92_v3 = vld [vmem:[%s2549_s0 + $0x8] sm:$0xff]  ;;  %v184_v4 = vld [vmem:[#allocation5 + $0x8] sm:$0xff]  ;;  %vm2279_vm1 = vmmov 0   ;;  %vm439_vm2 = vcmask 64512   ;;  %s2280_s0 = smov 104  }
  0x33   :  { %1995 = vmatprep.mubr.msk.f32.mxu1 %vm99_vm0, %v91_v2  ;;  %1992 = vmatpush3.msra.mxu1 %v98_v0  ;;  %v93_v5 = vld [vmem:[%s2550_s1] sm:$0xff]  ;;  %v183_v6 = vld [vmem:[#allocation5] sm:$0xff]  ;;  %v94_v7 = vld [vmem:[%s2550_s1 + $0x8] sm:$0xff]  ;;  %s2281_s1 = smov 120   ;;  %s2282_s21 = smov 112   ;;  %vm1464_vm3 = vcmask 195584  }
  0x34   :  { %1993 = vmatprep.subr.mxu1 %v97_v1  ;;  %2009 = vmatprep.mubr.msk.f32.mxu0 %vm99_vm0, %v93_v5  ;;  %v267_v8 = vld [vmem:[#allocation7 + $0x8] sm:$0xff]  ;;  %v266_v9 = vld [vmem:[#allocation7] sm:$0xff]  ;;  %v344_v11 = vld [vmem:[#allocation8 + $0x8] sm:$0xff]  ;;  %s2283_s4 = smov 16   ;;  %s2284_s12 = smov 24   ;;  %vm1796_vm4 = vcmask 261120  }
  0x35   :  { %1994 = vmatpush3.msra.mxu1 %v97_v1  ;;  %2005 = vmatprep.subr.mxu0 %v267_v8  ;;  %v343_v12 = vld [vmem:[#allocation8] sm:$0xff]  ;;  %v95_v33 = vld [vmem:[%s2551_s2] sm:$0xff]  ;;  %v96_v47 = vld [vmem:[%s2551_s2 + $0x8] sm:$0xff]  ;;  %s2285_s14 = smov [#allocation10]  }
  0x36   :  { %1996 = vmatmul.mubr.msk.f32.vlgmr.msra.gmra.mxu1 %vm99_vm0, %v92_v3  ;;  %1998 = vmatprep.subr.mxu1 %v184_v4  ;;  %s1885_s15 = sshll.u32 %s2285_s14, 4  ;;  %s1886_s15 = int_to_ptr.vmem [resolvable:$true] %s1885_s15 }
  0x37   :  { %1999 = vmatpush3.msra.mxu1 %v184_v4  ;;  %2002 = vmatprep.mubr.msk.f32.mxu1 %vm99_vm0, %v93_v5  ;;  %s2244_s6 = scalar_lea.vmem %s1886_s15, 256  ;;  %p2249_p7 = scmp.lt.s32.totalorder %s1886_s15, %s1886_s15 }
  0x38   :  { %2000 = vmatprep.subr.mxu1 %v183_v6  ;;  %2006 = vmatpush3.msra.mxu0 %v267_v8  ;;  %p2245_p6 = scmp.ne.s32.totalorder %s1886_s15, %s2244_s6  ;;  %p2250_p8 = scmp.lt.s32.totalorder %s2244_s6, %s2244_s6 }
  0x39   :  { %2001 = vmatpush3.msra.mxu1 %v183_v6  ;;  %2007 = vmatprep.subr.mxu0 %v266_v9 }
  0x3a   :  { %2003 = vmatmul.mubr.msk.f32.vlgmr.msra.gmra.mxu1 %vm99_vm0, %v94_v7  ;;  %2008 = vmatpush3.msra.mxu0 %v266_v9  ;;  %p2251_p9 = por %p2250_p8, %p2249_p7 }
  0x3b   :  { %2016 = vmatprep.mubr.msk.f32.mxu1 %vm99_vm0, %v91_v2  ;;  %2010 = vmatmul.mubr.msk.f32.vlgmr.msra.gmra.mxu0 %vm99_vm0, %v94_v7 }
  0x3c   :  { %2019 = vmatprep.subr.mxu0 %v2278_v10  ;;  %2021 = vmatprep.mubr.msk.f32.mxu0 %vm2279_vm1, %v2278_v10  ;;  %p2252_p10 = pnand %p2251_p9, %p2245_p6 }
  0x3d   :  { %2012 = vmatprep.subr.mxu1 %v344_v11 }
  0x3e   :  { %2013 = vmatpush3.msra.mxu1 %v344_v11 }
  0x3f   :  { %2014 = vmatprep.subr.mxu1 %v343_v12 }
  0x40   :  { %2015 = vmatpush3.msra.mxu1 %v343_v12 }
  0x41   :  { %2017 = vmatmul.mubr.msk.f32.vlgmr.msra.gmra.mxu1 %vm99_vm0, %v92_v3  ;;  %2024 = vmatprep.subr.mxu1 %v2278_v10 }
  0x42   :  { %2026 = vmatprep.mubr.msk.f32.mxu1 %vm2279_vm1, %v2278_v10 }
  0xf6   :  { %v1997_v13 = vpop.f32.mrf.mxu1 }
  0xf7   :  { %v182_v18 = vmul.f32 0.35355338, %v1997_v13 }
  0xf8   :  { %v172_v14 = vpop.f32.mrf.mxu1 }
  0xf9   :  { %v181_v15 = vmul.f32 0.35355338, %v172_v14 }
  0xfa   :  { %v2004_v16 = vpop.f32.mrf.mxu1 }
  0xfb   :  { %672 = vrot.lane.b32.xlu1 %v181_v15, %s2280_s0  ;;  %516 = vrot.lane.b32.xlu0 %v181_v15, %s2281_s1  ;;  %v2433_v29 = vpop.f32.mrf.mxu0 }
  0xfc   :  { %v257_v17 = vpop.f32.mrf.mxu1 }
  0xfd   :  { %2020 = vmatpush3.xpose.msk.msra.mxu0 %vm439_vm2, %v257_v17  ;;  %v334_v32 = vpop.f32.mrf.mxu0 }
  0xfe   :  { %2029 = vmatprep.subr.mxu0 %v2278_v10 }
  0xff   :  { %596 = vrot.lane.b32.xlu1 %v257_v17, %s2282_s21  ;;  %518 = vrot.lane.b32.xlu0 %v257_v17, %s2281_s1 }
 0x100   :  { %2022 = vmatmul.mubr.msk.f32.vlgmr.msra.gmra.mxu0 %vm439_vm2, %v181_v15 }
 0x101   :  { %2031 = vmatprep.mubr.msk.f32.mxu0 %vm2279_vm1, %v2278_v10  ;;  %v2450_v38 = vpop.f32.mrf.mxu1 }
 0x103   :  { %674 = vrot.lane.b32.xlu1 %v257_v17, %s2280_s0  ;;  %594 = vrot.lane.b32.xlu0 %v181_v15, %s2282_s21  ;;  %v2452_v39 = vpop.f32.mrf.mxu1 }
 0x107   :  { %826 = vrot.lane.b32.xlu1 %v182_v18, %s2281_s1  ;;  %828 = vrot.lane.b32.xlu0 %v2004_v16, %s2281_s1 }
 0x10b   :  { %984 = vrot.lane.b32.xlu1 %v2004_v16, %s2280_s0  ;;  %906 = vrot.lane.b32.xlu0 %v2004_v16, %s2282_s21 }
 0x10f   :  { %982 = vrot.lane.b32.xlu1 %v182_v18, %s2280_s0  ;;  %904 = vrot.lane.b32.xlu0 %v182_v18, %s2282_s21 }
 0x16d   :  { %v673_v19 = vpop.permute.xlu1 %672  ;;  %v517_v20 = vpop.permute.xlu0 %516 }
 0x171   :  { %v597_v21 = vpop.permute.xlu1 %596  ;;  %v519_v22 = vpop.permute.xlu0 %518 }
 0x172   :  { %2025 = vmatpush3.xpose.msk.msra.mxu1 %vm439_vm2, %v519_v22  ;;  %2030 = vmatpush3.xpose.msk.msra.mxu0 %vm439_vm2, %v597_v21 }
 0x173   :  { %2034 = vmatprep.subr.mxu1 %v2278_v10  ;;  %2039 = vmatprep.subr.mxu0 %v2278_v10 }
 0x175   :  { %v675_v23 = vpop.permute.xlu1 %674  ;;  %2027 = vmatmul.mubr.msk.f32.vlgmr.msra.gmra.mxu1 %vm439_vm2, %v517_v20  ;;  %v595_v24 = vpop.permute.xlu0 %594 }
 0x176   :  { %2032 = vmatmul.mubr.msk.f32.vlgmr.msra.gmra.mxu0 %vm439_vm2, %v595_v24  ;;  %2035 = vmatpush3.xpose.msk.msra.mxu1 %vm439_vm2, %v675_v23 }
 0x177   :  { %2040 = vmatpush3.xpose.msk.msra.mxu0 %vm439_vm2, %v2004_v16  ;;  %2036 = vmatprep.mubr.msk.f32.mxu1 %vm2279_vm1, %v2278_v10 }
 0x178   :  { %2044 = vmatprep.subr.mxu1 %v2278_v10  ;;  %2041 = vmatprep.mubr.msk.f32.mxu0 %vm2279_vm1, %v2278_v10 }
 0x179   :  { %v827_v25 = vpop.permute.xlu1 %826  ;;  %2037 = vmatmul.mubr.msk.f32.vlgmr.msra.gmra.mxu1 %vm439_vm2, %v673_v19  ;;  %v829_v26 = vpop.permute.xlu0 %828  ;;  %2049 = vmatprep.subr.mxu0 %v2278_v10 }
 0x17a   :  { %2042 = vmatmul.mubr.msk.f32.vlgmr.msra.gmra.mxu0 %vm439_vm2, %v182_v18  ;;  %2045 = vmatpush3.xpose.msk.msra.mxu1 %vm439_vm2, %v829_v26 }
 0x17b   :  { %2046 = vmatprep.mubr.msk.f32.mxu1 %vm2279_vm1, %v2278_v10  ;;  %2054 = vmatprep.subr.mxu1 %v2278_v10 }
 0x17c   :  { %2051 = vmatprep.mubr.msk.f32.mxu0 %vm2279_vm1, %v2278_v10 }
 0x17d   :  { %v985_v27 = vpop.permute.xlu1 %984  ;;  %2047 = vmatmul.mubr.msk.f32.vlgmr.msra.gmra.mxu1 %vm439_vm2, %v827_v25  ;;  %v907_v28 = vpop.permute.xlu0 %906 }
 0x17e   :  { %2050 = vmatpush3.xpose.msk.msra.mxu0 %vm439_vm2, %v907_v28  ;;  %2055 = vmatpush3.xpose.msk.msra.mxu1 %vm439_vm2, %v985_v27 }
 0x17f   :  { %2056 = vmatprep.mubr.msk.f32.mxu1 %vm2279_vm1, %v2278_v10  ;;  %2059 = vmatprep.subr.mxu0 %v2278_v10 }
 0x180   :  { %2064 = vmatprep.subr.mxu1 %v2278_v10 }
 0x181   :  { %v983_v30 = vpop.permute.xlu1 %982  ;;  %v905_v31 = vpop.permute.xlu0 %904 }
 0x182   :  { %2052 = vmatmul.mubr.msk.f32.vlgmr.msra.gmra.mxu0 %vm439_vm2, %v905_v31  ;;  %2057 = vmatmul.mubr.msk.f32.vlgmr.msra.gmra.mxu1 %vm439_vm2, %v983_v30 }
 0x183   :  { %2060 = vmatpush3.msra.mxu0 %v334_v32  ;;  %2061 = vmatprep.mubr.msk.f32.mxu0 %vm2279_vm1, %v2278_v10 }
 0x184   :  { %2069 = vmatprep.subr.mxu0 %v2278_v10  ;;  %2066 = vmatprep.mubr.msk.f32.mxu1 %vm2279_vm1, %v2278_v10 }
 0x1c0   :  { %v512_v34 = vpop.f32.mrf.mxu0 }
 0x1c1   :  { %v513_v35 = vadd.f32 %v512_v34, %v95_v33 }
 0x1c2   :  { %v2023_v36 = vpop.f32.mrf.mxu0 }
 0x1c3   :  { %v1060_v37 = vsel %vm439_vm2, %v513_v35, -inf }
 0x1c4   :  { %1061 = vmax.xlane.f32.xlu0 %v1060_v37 }
 0x235   :  { %v590_v40 = vpop.f32.mrf.mxu1 }
 0x236   :  { %v591_v41 = vadd.f32 %v590_v40, %v95_v33  ;;  %v668_v42 = vpop.f32.mrf.mxu0 }
 0x237   :  { %v669_v43 = vadd.f32 %v668_v42, %v95_v33  ;;  %v2028_v44 = vpop.f32.mrf.mxu1 }
 0x238   :  { %v2033_v45 = vpop.f32.mrf.mxu0  ;;  %v1063_v46 = vsel %vm439_vm2, %v591_v41, -inf }
 0x239   :  { %1064 = vmax.xlane.f32.xlu1 %v1063_v46  ;;  %v746_v48 = vpop.f32.mrf.mxu1  ;;  %v1066_v49 = vsel %vm439_vm2, %v669_v43, -inf }
 0x23a   :  { %v747_v50 = vadd.f32 %v746_v48, %v95_v33  ;;  %1067 = vmax.xlane.f32.xlu0 %v1066_v49  ;;  %v822_v51 = vpop.f32.mrf.mxu0 }
 0x23b   :  { %v823_v52 = vadd.f32 %v822_v51, %v96_v47  ;;  %v2038_v53 = vpop.f32.mrf.mxu1 }
 0x23c   :  { %v2043_v54 = vpop.f32.mrf.mxu0  ;;  %v1069_v55 = vsel %vm439_vm2, %v747_v50, -inf }
 0x23d   :  { %v900_v56 = vpop.f32.mrf.mxu1  ;;  %v1072_v57 = vsel %vm439_vm2, %v823_v52, -inf }
 0x23e   :  { %v901_v58 = vadd.f32 %v900_v56, %v96_v47  ;;  %1070 = vmax.xlane.f32.xlu0 %v1069_v55  ;;  %1073 = vmax.xlane.f32.xlu1 %v1072_v57 }
 0x23f   :  { %v2048_v59 = vpop.f32.mrf.mxu1 }
 0x240   :  { %v1075_v60 = vsel %vm439_vm2, %v901_v58, -inf }
 0x242   :  { %v1056_v61 = vpop.f32.mrf.mxu1  ;;  %1076 = vmax.xlane.f32.xlu0 %v1075_v60  ;;  %v978_v62 = vpop.f32.mrf.mxu0 }
 0x243   :  { %v1057_v63 = vadd.f32 %v1056_v61, %v96_v47  ;;  %v979_v0 = vadd.f32 %v978_v62, %v96_v47 }
 0x244   :  { %v2053_v1 = vpop.f32.mrf.mxu0  ;;  %v2058_v2 = vpop.f32.mrf.mxu1 }
 0x245   :  { %v1081_v3 = vsel %vm439_vm2, %v1057_v63, -inf  ;;  %v1078_v4 = vsel %vm439_vm2, %v979_v0, -inf }
 0x246   :  { %1082 = vmax.xlane.f32.xlu0 %v1081_v3  ;;  %1079 = vmax.xlane.f32.xlu1 %v1078_v4 }
 0x24d   :  { %v1062_v5 = vpop.xlane.xlu0 %1061 }
 0x24e   :  { %v1084_v6 = vsub.f32 %v513_v35, %v1062_v5 }
 0x250   :  { %v1092_v7 = vmul.f32 1.442695, %v1084_v6 }
 0x252   :  { %2124 = vpow2.f32 %v1092_v7 }
 0x257   :  { %1222 = vrot.lane.b32.xlu1 %v334_v32, %s2281_s1 }
 0x25b   :  { %1374 = vrot.lane.b32.xlu1 %v334_v32, %s2280_s0 }
 0x25c   :  { %1298 = vrot.lane.b32.xlu0 %v334_v32, %s2282_s21 }
 0x25f   :  { %1540 = vrot.lane.b32.xlu1 %v2433_v29, %s2281_s1  ;;  %v2125_v8 = vpop.eup %2124 }
 0x260   :  { %v1108_v9 = vsel %vm439_vm2, %v2125_v8, 0.0 }
 0x283   :  { %1109 = vadd.xlane.f32.xlu1 %v1108_v9 }
 0x2c2   :  { %v1065_v11 = vpop.xlane.xlu1 %1064 }
 0x2c3   :  { %v1085_v12 = vsub.f32 %v591_v41, %v1065_v11  ;;  %v1068_v13 = vpop.xlane.xlu0 %1067 }
 0x2c4   :  { %v1086_v14 = vsub.f32 %v669_v43, %v1068_v13 }
 0x2c5   :  { %v1094_v15 = vmul.f32 1.442695, %v1085_v12 }
 0x2c6   :  { %v1096_v16 = vmul.f32 1.442695, %v1086_v14 }
 0x2c7   :  { %2126 = vpow2.f32 %v1094_v15  ;;  %v1071_v17 = vpop.xlane.xlu0 %1070  ;;  %v1074_v18 = vpop.xlane.xlu1 %1073 }
 0x2c8   :  { %2128 = vpow2.f32 %v1096_v16  ;;  %v1087_v19 = vsub.f32 %v747_v50, %v1071_v17  ;;  %v1088_v20 = vsub.f32 %v823_v52, %v1074_v18  ;;  %v1788_v17 = vld [vmem:[%s2557_s8 + $0x18] sm:$0xff]  ;;  %v1787_v18 = vld [vmem:[%s2557_s8 + $0x10] sm:$0xff] }
 0x2ca   :  { %v1098_v21 = vmul.f32 1.442695, %v1087_v19  ;;  %v1100_v22 = vmul.f32 1.442695, %v1088_v20 }
 0x2cb   :  { %v1077_v23 = vpop.xlane.xlu0 %1076 }
 0x2cc   :  { %2130 = vpow2.f32 %v1098_v21  ;;  %v1089_v24 = vsub.f32 %v901_v58, %v1077_v23  ;;  %v1786_v21 = vld [vmem:[%s2557_s8 + $0x8] sm:$0xff]  ;;  %v1785_v23 = vld [vmem:[%s2557_s8] sm:$0xff] }
 0x2cd   :  { %2132 = vpow2.f32 %v1100_v22 }
 0x2ce   :  { %v1102_v25 = vmul.f32 1.442695, %v1089_v24 }
 0x2cf   :  { %v1083_v26 = vpop.xlane.xlu0 %1082  ;;  %v1080_v27 = vpop.xlane.xlu1 %1079 }
 0x2d0   :  { %2134 = vpow2.f32 %v1102_v25  ;;  %v1091_v28 = vsub.f32 %v1057_v63, %v1083_v26  ;;  %v1090_v30 = vsub.f32 %v979_v0, %v1080_v27 }
 0x2d2   :  { %v1106_v31 = vmul.f32 1.442695, %v1091_v28  ;;  %v1104_v32 = vmul.f32 1.442695, %v1090_v30 }
 0x2d3   :  { %v1223_v33 = vpop.permute.xlu1 %1222  ;;  %v1299_v55 = vpop.permute.xlu0 %1298 }
 0x2d4   :  { %v2127_v34 = vpop.eup %2126  ;;  %2136 = vpow2.f32 %v1106_v31  ;;  %2065 = vmatpush3.msra.mxu1 %v1223_v33 }
 0x2d5   :  { %v2129_v35 = vpop.eup %2128  ;;  %2138 = vpow2.f32 %v1104_v32  ;;  %v1111_v36 = vsel %vm439_vm2, %v2127_v34, 0.0  ;;  %2074 = vmatprep.subr.mxu1 %v2278_v10 }
 0x2d6   :  { %1112 = vadd.xlane.f32.xlu0 %v1111_v36  ;;  %v1114_v37 = vsel %vm439_vm2, %v2129_v35, 0.0 }
 0x2d7   :  { %1115 = vadd.xlane.f32.xlu1 %v1114_v37  ;;  %v1375_v50 = vpop.permute.xlu1 %1374 }
 0x2d9   :  { %v2131_v40 = vpop.eup %2130 }
 0x2da   :  { %v2133_v41 = vpop.eup %2132  ;;  %v1117_v42 = vsel %vm439_vm2, %v2131_v40, 0.0 }
 0x2db   :  { %1118 = vadd.xlane.f32.xlu0 %v1117_v42  ;;  %v1120_v43 = vsel %vm439_vm2, %v2133_v41, 0.0  ;;  %v1541_v51 = vpop.permute.xlu1 %1540 }
 0x2dc   :  { %1121 = vadd.xlane.f32.xlu1 %v1120_v43 }
 0x2dd   :  { %v2135_v44 = vpop.eup %2134 }
 0x2de   :  { %v1123_v45 = vsel %vm439_vm2, %v2135_v44, 0.0 }
 0x2df   :  { %1124 = vadd.xlane.f32.xlu0 %v1123_v45 }
 0x2e1   :  { %v2476_v46 = vpop.eup %2136 }
 0x2e2   :  { %v2478_v47 = vpop.eup %2138  ;;  %v1129_v48 = vsel %vm439_vm2, %v2476_v46, 0.0 }
 0x2e3   :  { %1130 = vadd.xlane.f32.xlu0 %v1129_v48  ;;  %v1126_v49 = vsel %vm439_vm2, %v2478_v47, 0.0 }
 0x2e4   :  { %1127 = vadd.xlane.f32.xlu1 %v1126_v49 }
 0x2f5   :  { %1692 = vrot.lane.b32.xlu1 %v2433_v29, %s2280_s0 }
 0x2f9   :  { %1616 = vrot.lane.b32.xlu0 %v2433_v29, %s2282_s21 }
 0x30c   :  { %v1110_v52 = vpop.xlane.xlu1 %1109 }
 0x30d   :  { %2140 = vrcp.f32 %v1110_v52 }
 0x31a   :  { %v2141_v53 = vpop.eup %2140 }
 0x31b   :  { %v1140_v54 = vmul.f32 %v2141_v53, %v2125_v8 }
 0x31d   :  { %2062 = vmatmul.mubr.msk.f32.vlgmr.msra.gmra.mxu0 %vm439_vm2, %v1140_v54 }
 0x31e   :  { %2070 = vmatpush3.msra.mxu0 %v1299_v55  ;;  %2071 = vmatprep.mubr.msk.f32.mxu0 %vm2279_vm1, %v2278_v10 }
 0x31f   :  { %2079 = vmatprep.subr.mxu0 %v2278_v10 }
 0x35f   :  { %v1113_v56 = vpop.xlane.xlu0 %1112 }
 0x360   :  { %2142 = vrcp.f32 %v1113_v56  ;;  %v1116_v57 = vpop.xlane.xlu1 %1115 }
 0x361   :  { %2144 = vrcp.f32 %v1116_v57 }
 0x364   :  { %v1119_v58 = vpop.xlane.xlu0 %1118 }
 0x365   :  { %2146 = vrcp.f32 %v1119_v58  ;;  %v1122_v59 = vpop.xlane.xlu1 %1121 }
 0x366   :  { %2148 = vrcp.f32 %v1122_v59 }
 0x368   :  { %v1125_v60 = vpop.xlane.xlu0 %1124 }
 0x369   :  { %2150 = vrcp.f32 %v1125_v60  ;;  %v1934_v60 = vld [vmem:[%s2558_s9] ss:$0 sm:$0xff] }
 0x36c   :  { %v1131_v61 = vpop.xlane.xlu0 %1130 }
 0x36d   :  { %v2143_v62 = vpop.eup %2142  ;;  %2152 = vrcp.f32 %v1131_v61  ;;  %v1128_v63 = vpop.xlane.xlu1 %1127 }
 0x36e   :  { %v2145_v0 = vpop.eup %2144  ;;  %2154 = vrcp.f32 %v1128_v63  ;;  %v1141_v1 = vmul.f32 %v2143_v62, %v2127_v34 }
 0x36f   :  { %v1142_v2 = vmul.f32 %v2145_v0, %v2129_v35  ;;  %v1905_v35 = vld [vmem:[%s2556_s7] ss:$0 sm:$0xff] }
 0x370   :  { %2067 = vmatmul.mubr.msk.f32.vlgmr.msra.gmra.mxu1 %vm439_vm2, %v1141_v1  ;;  %v1617_v8 = vpop.permute.xlu0 %1616  ;;  %v419_v36 = vadd.f32 %v1905_v35, %v2452_v39 }
 0x371   :  { %2075 = vmatpush3.msra.mxu1 %v1375_v50  ;;  %2072 = vmatmul.mubr.msk.f32.vlgmr.msra.gmra.mxu0 %vm439_vm2, %v1142_v2  ;;  %v1693_v9 = vpop.permute.xlu1 %1692 }
 0x372   :  { %v2147_v3 = vpop.eup %2146  ;;  %2080 = vmatpush3.msra.mxu0 %v2433_v29  ;;  %2076 = vmatprep.mubr.msk.f32.mxu1 %vm2279_vm1, %v2278_v10  ;;  %v1908_v37 = vmul.f32 -1.442695, %v419_v36 }
 0x373   :  { %v2149_v4 = vpop.eup %2148  ;;  %2081 = vmatprep.mubr.msk.f32.mxu0 %vm2279_vm1, %v2278_v10  ;;  %2084 = vmatprep.subr.mxu1 %v2278_v10  ;;  %v1143_v5 = vmul.f32 %v2147_v3, %v2131_v40  ;;  %v424_v40 = vadd.f32 %v2450_v38, %v1905_v35 }
 0x374   :  { %2089 = vmatprep.subr.mxu0 %v2278_v10  ;;  %v1144_v6 = vmul.f32 %v2149_v4, %v2133_v41  ;;  %2156 = vpow2.f32 %v1908_v37 }
 0x375   :  { %2077 = vmatmul.mubr.msk.f32.vlgmr.msra.gmra.mxu1 %vm439_vm2, %v1143_v5  ;;  %v1909_v41 = vmul.f32 -1.442695, %v424_v40 }
 0x376   :  { %v2151_v7 = vpop.eup %2150  ;;  %2082 = vmatmul.mubr.msk.f32.vlgmr.msra.gmra.mxu0 %vm439_vm2, %v1144_v6  ;;  %2085 = vmatpush3.msra.mxu1 %v1541_v51 }
 0x377   :  { %2090 = vmatpush3.msra.mxu0 %v1617_v8  ;;  %2086 = vmatprep.mubr.msk.f32.mxu1 %vm2279_vm1, %v2278_v10  ;;  %v1145_v29 = vmul.f32 %v2151_v7, %v2135_v44  ;;  %2158 = vpow2.f32 %v1909_v41 }
 0x378   :  { %2094 = vmatprep.subr.mxu1 %v2278_v10  ;;  %2091 = vmatprep.mubr.msk.f32.mxu0 %vm2279_vm1, %v2278_v10 }
 0x379   :  { %2087 = vmatmul.mubr.msk.f32.vlgmr.msra.gmra.mxu1 %vm439_vm2, %v1145_v29  ;;  %2099 = vmatprep.subr.mxu0 %v1788_v17 }
 0x37a   :  { %v2153_v11 = vpop.eup %2152  ;;  %2095 = vmatpush3.msra.mxu1 %v1693_v9  ;;  %2096 = vmatprep.mubr.msk.f32.mxu1 %vm2279_vm1, %v2278_v10 }
 0x37b   :  { %v2155_v12 = vpop.eup %2154  ;;  %v1147_v13 = vmul.f32 %v2153_v11, %v2476_v46 }
 0x37c   :  { %v1146_v14 = vmul.f32 %v2155_v12, %v2478_v47 }
 0x37d   :  { %2097 = vmatmul.mubr.msk.f32.vlgmr.msra.gmra.mxu1 %vm439_vm2, %v1147_v13 }
 0x37e   :  { %2092 = vmatmul.mubr.msk.f32.vlgmr.msra.gmra.mxu0 %vm439_vm2, %v1146_v14 }
 0x37f   :  { %2100 = vmatpush3.msra.mxu0 %v1788_v17 }
 0x380   :  { %2101 = vmatprep.subr.mxu0 %v1787_v18 }
 0x381   :  { %2102 = vmatpush3.msra.mxu0 %v1787_v18  ;;  %v2157_v42 = vpop.eup %2156 }
 0x382   :  { %2103 = vmatprep.subr.mxu0 %v1786_v21  ;;  %v433_v43 = vadd.f32 1.0, %v2157_v42 }
 0x383   :  { %2104 = vmatpush3.msra.mxu0 %v1786_v21 }
 0x384   :  { %2105 = vmatprep.subr.mxu0 %v1785_v23  ;;  %2160 = vrcp.f32 %v433_v43  ;;  %v2159_v44 = vpop.eup %2158 }
 0x385   :  { %2106 = vmatpush3.msra.mxu0 %v1785_v23  ;;  %v434_v45 = vadd.f32 1.0, %v2159_v44 }
 0x387   :  { %2162 = vrcp.f32 %v434_v45 }
 0x391   :  { %v2161_v50 = vpop.eup %2160 }
 0x394   :  { %v2163_v57 = vpop.eup %2162 }
 0x3dd   :  { %v1217_v15 = vpop.f32.mrf.mxu0 }
 0x3df   :  { %v2063_v16 = vpop.f32.mrf.mxu0 }
 0x430   :  { %v1294_v10 = vpop.f32.mrf.mxu1 }
 0x431   :  { %1451 = vrot.lane.b32.xlu0 %v1294_v10, %s2275_s19  ;;  %v1370_v19 = vpop.f32.mrf.mxu0 }
 0x432   :  { %v2068_v20 = vpop.f32.mrf.mxu1  ;;  %1455 = vrot.lane.b32.xlu1 %v1370_v19, %s2283_s4 }
 0x433   :  { %v2073_v22 = vpop.f32.mrf.mxu0 }
 0x435   :  { %v1446_v24 = vpop.f32.mrf.mxu1 }
 0x436   :  { %v1535_v25 = vpop.f32.mrf.mxu0  ;;  %1459 = vrot.lane.b32.xlu1 %v1446_v24, %s2284_s12 }
 0x437   :  { %v2078_v26 = vpop.f32.mrf.mxu1 }
 0x438   :  { %v2083_v27 = vpop.f32.mrf.mxu0 }
 0x439   :  { %v1612_v28 = vpop.f32.mrf.mxu1 }
 0x43a   :  { %1769 = vrot.lane.b32.xlu0 %v1612_v28, %s2275_s19 }
 0x43b   :  { %v2088_v30 = vpop.f32.mrf.mxu1 }
 0x43d   :  { %v1764_v31 = vpop.f32.mrf.mxu1 }
 0x43e   :  { %v1688_v32 = vpop.f32.mrf.mxu0  ;;  %1777 = vrot.lane.b32.xlu1 %v1764_v31, %s2284_s12 }
 0x43f   :  { %1773 = vrot.lane.b32.xlu0 %v1688_v32, %s2283_s4  ;;  %v2098_v33 = vpop.f32.mrf.mxu1 }
 0x440   :  { %v2093_v34 = vpop.f32.mrf.mxu0 }
 0x4a3   :  { %v1452_v46 = vpop.permute.xlu0 %1451 }
 0x4a4   :  { %v1456_v47 = vpop.permute.xlu1 %1455  ;;  %v1462_v48 = vsel %vm439_vm2, %v1217_v15, %v1452_v46 }
 0x4a5   :  { %v1463_v49 = vsel %vm99_vm0, %v1462_v48, %v1456_v47 }
 0x4a8   :  { %v1460_v39 = vpop.permute.xlu1 %1459 }
 0x4a9   :  { %v1465_v51 = vsel %vm1464_vm3, %v1463_v49, %v1460_v39 }
 0x4aa   :  { %v1783_v38 = vmul.f32 %v2161_v50, %v1465_v51 }
 0x4ac   :  { %v1770_v52 = vpop.permute.xlu0 %1769  ;;  %2107 = vmatprep.mubr.msk.f32.mxu0 %vm1796_vm4, %v1783_v38 }
 0x4ad   :  { %v1780_v54 = vsel %vm439_vm2, %v1535_v25, %v1770_v52 }
 0x4b0   :  { %v1778_v53 = vpop.permute.xlu1 %1777 }
 0x4b1   :  { %v1774_v55 = vpop.permute.xlu0 %1773 }
 0x4b2   :  { %v1781_v56 = vsel %vm99_vm0, %v1780_v54, %v1774_v55 }
 0x4b3   :  { %v1782_v58 = vsel %vm1464_vm3, %v1781_v56, %v1778_v53 }
 0x4b4   :  { %v1784_v59 = vmul.f32 %v2163_v57, %v1782_v58 }
 0x4b6   :  { %2108 = vmatmul.mubr.msk.f32.vlgmr.msra.gmra.mxu0 %vm1796_vm4, %v1784_v59 }
 0x576   :  { %v2109_v61 = vpop.f32.mrf.mxu0 }
 0x577   :  { %v1875_v62 = vadd.f32 %v2109_v61, %v1934_v60 }
 0x578   :  { %v1869_v63 = vpop.f32.mrf.mxu0 }
 0x579   :  { %1879 = vst.msk [vmem:[#allocation10 + $0x8] sm:$0xff] %vm99_vm0, %v1875_v62  ;;  %v1870_v0 = vadd.f32 %v1934_v60, %v1869_v63 }
 0x57b   :  { %1878 = vst.msk [vmem:[#allocation10] sm:$0xff] %vm99_vm0, %v1870_v0 }
 0x57c   :  { %2255 = shalt.err (!%p2252_p10)
}
 0x57d   :  { %1891 = dma.vmem_to_hbm [thread:$0]  %s1886_s15, 256, %s2559_s10, [#allocation4], %s2274_s18, %s2274_s18, %s2275_s19  }
 0x57e   :  { %2270 = dma.done.wait [#allocation4], 256  }
 0x57f   :  { %2271 = vsyncadd [#allocation4], 4294967040 }
 0x580   :  { %1895 = vsyncpa [#allocation3], 1 }
 0x581   :  { %1896 = vsyncpa [#allocation6], 1 }
 0x582   :  { %1897 = vsyncpa [#allocation9], 1 }
 0x583   :  { %1898 = vsyncpa [#allocation4], 1 }

</bundles_post_ra>
